<compile_context>
chip_gen: v6e
topology: v6e:2x2x1
jax: 0.10.0
libtpu: 0.0.40
codegen_flags: <defaults>
</compile_context>

<pallas_src>
import jax
import jax.numpy as jnp
from jax.experimental import pallas as pl
from jax.experimental.pallas import tpu as pltpu


def _round_up(x: int, m: int) -> int:
    return ((x + m - 1) // m) * m


def _divisor_tile(dim_p: int, pref: int) -> int:
    """Largest multiple of 128 that is <= pref and divides dim_p (dim_p % 128 == 0)."""
    t = min(_round_up(pref, 128), dim_p)
    t = max((t // 128) * 128, 128)
    while dim_p % t:
        t -= 128
    return t


def _pad_cast_2d(a, rows: int, cols: int, dtype):
    """Cast (no-op if already dtype) and zero-pad in a single fused pad op."""
    r, c = a.shape
    a = a.astype(dtype)
    if (r, c) != (rows, cols):
        a = jnp.pad(a, ((0, rows - r), (0, cols - c)))
    return a


def _stable_sigmoid(z):
    # 0.5*(tanh(z/2)+1): one EUP transcendental, stable for arbitrarily large |z|.
    return 0.5 * (jnp.tanh(0.5 * z) + 1.0)


def prepare_params(w, b, compute_dtype=jnp.bfloat16):
    """One-time (weight-load-time) prep: transpose W, pad to lane multiples, cast.

    w: (D_out, D_in), b: (D_out,). Returns (w_t_padded, b_padded, D_out) where
    w_t_padded is (D_in_p, D_out_p) in compute_dtype and b_padded is (1, D_out_p) f32.
    """
    D_out, D_in = w.shape
    D_in_p = _round_up(D_in, 128)
    D_out_p = _round_up(D_out, 128)
    wt = w.T.astype(compute_dtype)
    if (D_in_p, D_out_p) != (D_in, D_out):
        wt = jnp.pad(wt, ((0, D_in_p - D_in), (0, D_out_p - D_out)))
    bp = b.astype(jnp.float32)
    if D_out_p != D_out:
        bp = jnp.pad(bp, (0, D_out_p - D_out))
    return wt, bp.reshape(1, D_out_p), D_out


# ---------------- kernels ----------------

def _logreg_resident_kernel(x_ref, w_ref, b_ref, o_ref):
    # Whole (pre-transposed) W and bias stay VMEM-resident; one MXU pass per
    # batch tile, bias + stable sigmoid fused in the same step (f32 epilogue).
    z = jnp.dot(x_ref[...], w_ref[...], preferred_element_type=jnp.float32)
    o_ref[...] = _stable_sigmoid(z + b_ref[...]).astype(o_ref.dtype)


def _logreg_tiled_kernel(x_ref, w_ref, b_ref, o_ref):
    # General (i, j, k) path: accumulate directly into the f32 output block
    # (its block index is constant in k, so it stays VMEM-resident) -> no
    # separate accumulator scratch.
    k = pl.program_id(2)

    @pl.when(k == 0)
    def _init():
        o_ref[...] = jnp.zeros_like(o_ref)

    o_ref[...] += jnp.dot(x_ref[...], w_ref[...],
                          preferred_element_type=jnp.float32)

    @pl.when(k == pl.num_programs(2) - 1)
    def _finalize():
        o_ref[...] = _stable_sigmoid(o_ref[...] + b_ref[...])


# ---------------- wrapper ----------------

def logistic_regression(x, w_t_p, b_p, d_out, *, tm=512, tn=256, tk=1024,
                        max_resident_w_bytes=16 * 2**20):
    """out = sigmoid(x @ w.T + b), matching torch.nn.Linear + sigmoid.

    x: (B, D_in); (w_t_p, b_p, d_out) come from prepare_params() (done once at
    weight-load time). MXU inputs use w_t_p.dtype (bf16 default, valid on
    v5e/v6e/v7x); accumulation + bias/sigmoid epilogue are always f32.
    """
    compute_dtype = w_t_p.dtype
    B, D_in = x.shape
    D_in_p, D_out_p = w_t_p.shape
    itemsize = jnp.dtype(compute_dtype).itemsize
    m_align = 16 if itemsize < 4 else 8     # bf16 packs 16 rows per vreg

    # Batch tile: as large as useful, aligned, and (when the batch allows it)
    # giving >= 2 parallel grid points so both v7x TensorCores are used.
    tm = max(m_align, min(tm, _round_up(B, m_align)))
    tm = _round_up(tm, m_align)
    Bp0 = _round_up(B, m_align)
    if Bp0 // tm < 2 and Bp0 >= 2 * m_align:
        tm = _round_up(max(Bp0 // 2, m_align), m_align)
    Bp = _round_up(B, tm)

    xp = _pad_cast_2d(x, Bp, D_in_p, compute_dtype)   # no-op copy when aligned

    # ---- W-resident path (common logistic-regression regime) ----
    resident_fp = (2 * tm * D_in_p * itemsize          # x, double-buffered
                   + 2 * D_in_p * D_out_p * itemsize   # W (conservative 2x)
                   + 2 * D_out_p * 4                   # bias
                   + 2 * tm * D_out_p * 4)             # out, double-buffered
    use_resident = (D_in_p * D_out_p * itemsize <= max_resident_w_bytes
                    and resident_fp <= 24 * 2**20)     # fits v7x 64 MiB w/ headroom

    if use_resident:
        vmem_limit = max(int(1.5 * resident_fp), 32 * 2**20)
        out_padded = pl.pallas_call(
            _logreg_resident_kernel,
            out_shape=jax.ShapeDtypeStruct((Bp, D_out_p), jnp.float32),
            grid_spec=pltpu.PrefetchScalarGridSpec(
                num_scalar_prefetch=0,
                grid=(Bp // tm,),
                in_specs=[
                    pl.BlockSpec((tm, D_in_p), lambda i: (i, 0)),        # x tiles
                    pl.BlockSpec((D_in_p, D_out_p), lambda i: (0, 0)),   # W resident
                    pl.BlockSpec((1, D_out_p), lambda i: (0, 0)),        # bias resident
                ],
                out_specs=pl.BlockSpec((tm, D_out_p), lambda i: (i, 0)),
            ),
            compiler_params=pltpu.CompilerParams(
                dimension_semantics=("parallel",),
                vmem_limit_bytes=int(vmem_limit),
            ),
        )(xp, w_t_p, b_p)
        return out_padded[:B, :d_out]

    # ---- general tiled (i, j, k) path ----
    tn = _divisor_tile(D_out_p, tn)
    tk = _divisor_tile(D_in_p, tk)
    grid = (Bp // tm, D_out_p // tn, D_in_p // tk)

    tiled_fp = (2 * tm * tk * itemsize + 2 * tk * tn * itemsize
                + 2 * tn * 4 + 2 * tm * tn * 4)
    vmem_limit = max(int(1.5 * tiled_fp), 32 * 2**20)

    out_padded = pl.pallas_call(
        _logreg_tiled_kernel,
        out_shape=jax.ShapeDtypeStruct((Bp, D_out_p), jnp.float32),
        grid_spec=pltpu.PrefetchScalarGridSpec(
            num_scalar_prefetch=0,
            grid=grid,
            in_specs=[
                pl.BlockSpec((tm, tk), lambda i, j, k: (i, k)),   # x
                pl.BlockSpec((tk, tn), lambda i, j, k: (k, j)),   # W (pre-transposed)
                pl.BlockSpec((1, tn), lambda i, j, k: (0, j)),    # bias, const in i,k
            ],
            out_specs=pl.BlockSpec((tm, tn), lambda i, j, k: (i, j)),
        ),
        compiler_params=pltpu.CompilerParams(
            dimension_semantics=("parallel", "parallel", "arbitrary"),
            vmem_limit_bytes=int(vmem_limit),
        ),
    )(xp, w_t_p, b_p)
    # NOTE: if profiling ever shows exposed DMA on the k loop, add
    # pipeline_mode=pl.Buffered(3) to the x / W BlockSpecs (cheap sweep).
    return out_padded[:B, :d_out]


if __name__ == "__main__":
    # Shapes implied by nn.Linear(input_size, output_size) on a small batch.
    batch = 8
    input_size = 32
    output_size = 16

    key = jax.random.PRNGKey(0)
    kx, kw, kb = jax.random.split(key, 3)

    x = jax.random.normal(kx, (batch, input_size), dtype=jnp.float32)
    # torch.nn.Linear default init bound = 1/sqrt(fan_in); emulate deterministically.
    bound = 1.0 / (input_size ** 0.5)
    w = jax.random.uniform(kw, (output_size, input_size), jnp.float32, -bound, bound)
    b = jax.random.uniform(kb, (output_size,), jnp.float32, -bound, bound)

    ref = jax.nn.sigmoid(x @ w.T + b)

    # Default bf16-MXU path (W-resident), weight prep done once.
    wt_bf16, bp, d_out = prepare_params(w, b)                    # bf16 default
    out_bf16 = logistic_regression(x, wt_bf16, bp, d_out)
    jax.block_until_ready(out_bf16)
    assert out_bf16.shape == (batch, output_size)
    assert jnp.allclose(out_bf16, ref, atol=2e-2, rtol=2e-2), "bf16 path mismatch"

    # f32-MXU path (tight check).
    wt_f32, bp_f32, _ = prepare_params(w, b, compute_dtype=jnp.float32)
    out_f32 = logistic_regression(x, wt_f32, bp_f32, d_out)
    jax.block_until_ready(out_f32)
    assert jnp.allclose(out_f32, ref, atol=2e-3, rtol=2e-3), "f32 path mismatch"

    # Force the general tiled (i, j, k) path to exercise it as well.
    out_tiled = logistic_regression(x, wt_f32, bp_f32, d_out,
                                    max_resident_w_bytes=0)
    jax.block_until_ready(out_tiled)
    assert jnp.allclose(out_tiled, ref, atol=2e-3, rtol=2e-3), "tiled path mismatch"

    print("KERNEL_OK")
</pallas_src>

<mosaic_0001>
module attributes {stable_mosaic.version = 11 : i64} {
  func.func @_logreg_resident_kernel(%arg0: i32, %arg1: memref<16x128xbf16, #tpu.memory_space<vmem>>, %arg2: memref<128x128xbf16, #tpu.memory_space<vmem>>, %arg3: memref<1x128xf32, #tpu.memory_space<vmem>>, %arg4: memref<16x128xf32, #tpu.memory_space<vmem>>) attributes {dimension_semantics = [#tpu.dimension_semantics<parallel>], iteration_bounds = array<i64: 1>, scalar_prefetch = 0 : i64, scratch_operands = 0 : i64, tpu.core_type = #tpu.core_type<tc>, window_params = [{transform_indices = @transform_0, window_bounds = array<i64: 16, 128>}, {pipeline_mode = #tpu.pipeline_mode<synchronous>, transform_indices = @transform_1, window_bounds = array<i64: 128, 128>}, {pipeline_mode = #tpu.pipeline_mode<synchronous>, transform_indices = @transform_2, window_bounds = array<i64: 1, 128>}, {transform_indices = @transform_3, window_bounds = array<i64: 16, 128>}]} {
    %c0 = arith.constant 0 : index
    %c0_0 = arith.constant 0 : index
    %0 = vector.load %arg1[%c0, %c0_0] : memref<16x128xbf16, #tpu.memory_space<vmem>>, vector<16x128xbf16>
    %c0_1 = arith.constant 0 : index
    %c0_2 = arith.constant 0 : index
    %1 = vector.load %arg2[%c0_1, %c0_2] : memref<128x128xbf16, #tpu.memory_space<vmem>>, vector<128x128xbf16>
    %cst = arith.constant dense<0.000000e+00> : vector<16x128xf32>
    %2 = tpu.matmul %0, %1, %cst {dimension_numbers = #tpu.dot_dimension_numbers<[1], [0], [0], [1], [0, 0, 1, 1], [], []>} : vector<16x128xbf16>, vector<128x128xbf16>, vector<16x128xf32> -> vector<16x128xf32>
    %c0_3 = arith.constant 0 : index
    %c0_4 = arith.constant 0 : index
    %3 = vector.load %arg3[%c0_3, %c0_4] : memref<1x128xf32, #tpu.memory_space<vmem>>, vector<1x128xf32>
    %4 = vector.broadcast %3 : vector<1x128xf32> to vector<16x128xf32>
    %5 = arith.addf %2, %4 : vector<16x128xf32>
    %cst_5 = arith.constant 5.000000e-01 : f32
    %6 = vector.broadcast %cst_5 : f32 to vector<16x128xf32>
    %7 = arith.mulf %6, %5 : vector<16x128xf32>
    %8 = math.tanh %7 : vector<16x128xf32>
    %cst_6 = arith.constant 1.000000e+00 : f32
    %9 = vector.broadcast %cst_6 : f32 to vector<16x128xf32>
    %10 = arith.addf %8, %9 : vector<16x128xf32>
    %cst_7 = arith.constant 5.000000e-01 : f32
    %11 = vector.broadcast %cst_7 : f32 to vector<16x128xf32>
    %12 = arith.mulf %11, %10 : vector<16x128xf32>
    %c0_8 = arith.constant 0 : index
    %c0_9 = arith.constant 0 : index
    %13 = vector.load %arg4[%c0_8, %c0_9] : memref<16x128xf32, #tpu.memory_space<vmem>>, vector<16x128xf32>
    tpu.vector_store %arg4[%c0_8, %c0_9], %12 {strides = array<i32>} : memref<16x128xf32, #tpu.memory_space<vmem>>, vector<16x128xf32>,
    return
  }
  func.func @transform_0(%arg0: i32) -> (i32, i32) {
    %c0_i32 = arith.constant 0 : i32
    %c0_i32_0 = arith.constant 0 : i32
    return %arg0, %c0_i32 : i32, i32
  }
  func.func @transform_1(%arg0: i32) -> (i32, i32) {
    %c0_i32 = arith.constant 0 : i32
    %c0_i32_0 = arith.constant 0 : i32
    %c0_i32_1 = arith.constant 0 : i32
    return %c0_i32, %c0_i32_0 : i32, i32
  }
  func.func @transform_2(%arg0: i32) -> (i32, i32) {
    %c0_i32 = arith.constant 0 : i32
    %c0_i32_0 = arith.constant 0 : i32
    %c0_i32_1 = arith.constant 0 : i32
    return %c0_i32, %c0_i32_0 : i32, i32
  }
  func.func @transform_3(%arg0: i32) -> (i32, i32) {
    %c0_i32 = arith.constant 0 : i32
    %c0_i32_0 = arith.constant 0 : i32
    return %arg0, %c0_i32 : i32, i32
  }
}

</mosaic_0001>

<bundles_post_ra>
// kernel: tpu_custom_call.1
= control target key start
LH: loop header
LB: loop body
LE: loop exit
PB: predicated region body
PF: predicated region fallthrough
CT: control target
= control target key end

     0   :  { %8 = vsyncpa [#allocation3], 0  ;;  %s360_s0 = inlined_call_operand.hbm [shape: bf16[16,128], index: 0, kind: input, shape index: {}]   ;;  %s361_s1 = inlined_call_operand.hbm [shape: bf16[128,128], index: 1, kind: input, shape index: {}]   ;;  %s362_s2 = inlined_call_operand.vmem [shape: f32[1,128], index: 2, kind: input, shape index: {}]   ;;  %s363_s3 = inlined_call_operand.hbm [shape: f32[16,128], index: 3, kind: output, shape index: {}]  }
   0x1   :  { %9 = vsyncpa [#allocation6], 0 }
   0x2   :  { %10 = vsyncpa [#allocation4], 0  ;;  %s319_s12 = smov [#allocation2]  }
   0x3   :  { %s16_s13 = sshll.u32 %s319_s12, 4  ;;  %s17_s13 = int_to_ptr.vmem [resolvable:$true] %s16_s13 }
   0x4   :  { %s261_s14 = scalar_lea.vmem %s17_s13, 128  ;;  %p266_p1 = scmp.lt.s32.totalorder %s17_s13, %s17_s13 }
   0x5   :  { %p262_p0 = scmp.ne.s32.totalorder %s17_s13, %s261_s14  ;;  %p267_p2 = scmp.lt.s32.totalorder %s261_s14, %s261_s14 }
   0x7   :  { %p268_p3 = por %p267_p2, %p266_p1 }
   0x9   :  { %p269_p4 = pnand %p268_p3, %p262_p0 }
   0xb   :  { %272 = shalt.err (!%p269_p4)
}
   0xc   :  { %s320_s15 = smov 64   ;;  %s321_s16 = smov 4  }
   0xd   :  { %22 = dma.hbm_to_vmem [thread:$0]  %s360_s0, 128, %s17_s13, [#allocation3], %s320_s15, %s320_s15, %s321_s16  }
   0xe   :  { %s322_s19 = smov [#allocation5]  }
   0xf   :  { %s28_s20 = sshll.u32 %s322_s19, 4  ;;  %s29_s20 = int_to_ptr.vmem [resolvable:$true] %s28_s20 }
  0x10   :  { %s281_s21 = scalar_lea.vmem %s29_s20, 1024  ;;  %p286_p6 = scmp.lt.s32.totalorder %s29_s20, %s29_s20 }
  0x11   :  { %p282_p5 = scmp.ne.s32.totalorder %s29_s20, %s281_s21  ;;  %p287_p7 = scmp.lt.s32.totalorder %s281_s21, %s281_s21 }
  0x13   :  { %p288_p8 = por %p287_p7, %p286_p6 }
  0x15   :  { %p289_p9 = pnand %p288_p8, %p282_p5 }
  0x17   :  { %292 = shalt.err (!%p289_p9)
}
  0x18   :  { %34 = dma.hbm_to_vmem [thread:$0]  %s361_s1, 1024, %s29_s20, [#allocation6], %s320_s15, %s320_s15, %s321_s16  }
  0x19   :  { %313 = dma.done.wait [#allocation3], 128  }
  0x1a   :  { %314 = vsyncadd [#allocation3], 4294967168 }
  0x1b   :  { %315 = dma.done.wait [#allocation6], 1024  }
  0x1c   :  { %316 = vsyncadd [#allocation6], 4294966272  ;;  %v323_v0 = vmov 0.0   ;;  %vm324_vm0 = vmmov 0   ;;  %v240_v1 = vld [vmem:[#allocation5 + $0x38] sm:$0xff]   ;;  %v241_v2 = vld [vmem:[#allocation5 + $0x30] sm:$0xff]  }
  0x1d   :  { %211 = vmatprep.subr.bf16.mxu0 %v323_v0  ;;  %227 = vmatprep.mubr.msk.bf16.mxu0 %vm324_vm0, %v323_v0  ;;  %v242_v3 = vld [vmem:[#allocation5 + $0x28] sm:$0xff]   ;;  %v243_v4 = vld [vmem:[#allocation5 + $0x20] sm:$0xff]   ;;  %v244_v5 = vld [vmem:[#allocation5 + $0x18] sm:$0xff]   ;;  %s325_s24 = smov [#allocation7]  }
  0x1e   :  { %212 = vmatpush3.bf16.msra.mxu0 %v240_v1  ;;  %v245_v6 = vld [vmem:[#allocation5 + $0x10] sm:$0xff]   ;;  %v246_v7 = vld [vmem:[#allocation5 + $0x8] sm:$0xff]   ;;  %v247_v8 = vld [vmem:[#allocation5] sm:$0xff]   ;;  %s179_s25 = sshll.u32 %s325_s24, 4  ;;  %s180_s25 = int_to_ptr.vmem [resolvable:$true] %s179_s25 }
  0x1f   :  { %213 = vmatprep.subr.bf16.mxu0 %v323_v0  ;;  %v248_v9 = vld [vmem:[#allocation2] sm:$0xff]   ;;  %p298_p11 = scmp.lt.s32.totalorder %s180_s25, %s180_s25 }
  0x20   :  { %v192_v10 = vld [vmem:[%s362_s2] ss:$0 sm:$0xff]  ;;  %s293_s2 = scalar_lea.vmem %s180_s25, 256 }
  0x21   :  { %p294_p10 = scmp.ne.s32.totalorder %s180_s25, %s293_s2  ;;  %p299_p12 = scmp.lt.s32.totalorder %s293_s2, %s293_s2 }
  0x22   :  { %214 = vmatpush3.bf16.msra.mxu0 %v241_v2 }
  0x23   :  { %215 = vmatprep.subr.bf16.mxu0 %v323_v0  ;;  %p300_p13 = por %p299_p12, %p298_p11 }
  0x25   :  { %p301_p0 = pnand %p300_p13, %p294_p10 }
  0x26   :  { %216 = vmatpush3.bf16.msra.mxu0 %v242_v3 }
  0x27   :  { %217 = vmatprep.subr.bf16.mxu0 %v323_v0 }
  0x2a   :  { %218 = vmatpush3.bf16.msra.mxu0 %v243_v4 }
  0x2b   :  { %219 = vmatprep.subr.bf16.mxu0 %v323_v0 }
  0x2e   :  { %220 = vmatpush3.bf16.msra.mxu0 %v244_v5 }
  0x2f   :  { %221 = vmatprep.subr.bf16.mxu0 %v323_v0 }
  0x32   :  { %222 = vmatpush3.bf16.msra.mxu0 %v245_v6 }
  0x33   :  { %223 = vmatprep.subr.bf16.mxu0 %v323_v0 }
  0x36   :  { %224 = vmatpush3.bf16.msra.mxu0 %v246_v7 }
  0x37   :  { %225 = vmatprep.subr.bf16.mxu0 %v323_v0 }
  0x3a   :  { %226 = vmatpush3.bf16.msra.mxu0 %v247_v8 }
  0x3d   :  { %228 = vmatmul.mubr.bf16.vlgmr.msra.gmra.mxu0 %v248_v9 }
  0xfd   :  { %v157_v11 = vpop.f32.mrf.mxu0 }
  0xfe   :  { %v158_v12 = vadd.f32 %v192_v10, %v157_v11 }
  0xff   :  { %v229_v13 = vpop.f32.mrf.mxu0 }
 0x100   :  { %v164_v14 = vmul.f32 0.5, %v158_v12 }
 0x101   :  { %v160_v15 = vpop.f32.mrf.mxu0 }
 0x102   :  { %249 = vtanh.f32 %v164_v14  ;;  %v161_v16 = vadd.f32 %v192_v10, %v160_v15 }
 0x103   :  { %v230_v17 = vpop.f32.mrf.mxu0 }
 0x104   :  { %v165_v18 = vmul.f32 0.5, %v161_v16 }
 0x106   :  { %251 = vtanh.f32 %v165_v18 }
 0x10f   :  { %v250_v19 = vpop.eup %249 }
 0x110   :  { %v168_v20 = vadd.f32 1.0, %v250_v19 }
 0x112   :  { %v170_v21 = vmul.f32 0.5, %v168_v20 }
 0x113   :  { %v252_v22 = vpop.eup %251 }
 0x114   :  { %172 = vst [vmem:[#allocation7] sm:$0xff] %v170_v21  ;;  %v169_v23 = vadd.f32 1.0, %v252_v22 }
 0x116   :  { %v171_v24 = vmul.f32 0.5, %v169_v23 }
 0x118   :  { %173 = vst [vmem:[#allocation7 + $0x8] sm:$0xff] %v171_v24 }
 0x119   :  { %304 = shalt.err (!%p301_p0)
}
 0x11a   :  { %s326_s26 = smov 128   ;;  %s327_s27 = smov 8  }
 0x11b   :  { %185 = dma.vmem_to_hbm [thread:$0]  %s180_s25, 256, %s363_s3, [#allocation4], %s326_s26, %s326_s26, %s327_s27  }
 0x11c   :  { %317 = dma.done.wait [#allocation4], 256  }
 0x11d   :  { %318 = vsyncadd [#allocation4], 4294967040 }
 0x11e   :  { %189 = vsyncpa [#allocation3], 1 }
 0x11f   :  { %190 = vsyncpa [#allocation6], 1 }
 0x120   :  { %191 = vsyncpa [#allocation4], 1 }

</bundles_post_ra>
